<compile_context>
chip_gen: v5e
topology: v5e:2x2
jax: 0.10.0
libtpu: 0.0.40
codegen_flags: <defaults>
</compile_context>

<pallas_src>
import functools

import jax
import jax.numpy as jnp
from jax import lax
from jax.experimental import pallas as pl
from jax.experimental.pallas import tpu as pltpu

LANE = 128  # TPU vreg lane width


def _round_up(x, m):
    return (x + m - 1) // m * m


# ----------------------------- Pallas kernel --------------------------------
def mlp_kernel(x_ref, y_ref, w0x_ref, w0y_ref, b0_ref,
               w1_ref, b1_ref, w2_ref, b2_ref, out_ref):
    # First layer as a split matmul (replaces the concat of x / y_features).
    dot = functools.partial(jnp.dot, preferred_element_type=jnp.float32,
                            precision=lax.Precision.HIGHEST)
    h = dot(x_ref[...], w0x_ref[...]) + dot(y_ref[...], w0y_ref[...])
    h = jnp.maximum(h + b0_ref[...], 0.0)                    # relu_0
    h = jnp.maximum(dot(h, w1_ref[...]) + b1_ref[...], 0.0)  # relu_1
    o = dot(h, w2_ref[...]) + b2_ref[...]                    # output_layer
    out_ref[...] = o.astype(out_ref.dtype)


# --------------------------- parameter preparation --------------------------
def prepare_padded_params(params, x_size):
    """Split w0 by input source and zero-pad hidden/output dims to 128 lanes."""
    w0, b0, w1, b1, w2, b2 = params
    h0, h1, out_dim = w0.shape[1], w1.shape[1], w2.shape[1]
    h0p, h1p, outp = (_round_up(d, LANE) for d in (h0, h1, out_dim))

    def pad2(a, rows, cols):
        return jnp.pad(a, ((0, rows - a.shape[0]), (0, cols - a.shape[1])))

    w0x = pad2(w0[:x_size], x_size, h0p)
    w0y = pad2(w0[x_size:], w0.shape[0] - x_size, h0p)
    b0p = pad2(b0, 1, h0p)
    w1p = pad2(w1, h0p, h1p)
    b1p = pad2(b1, 1, h1p)
    w2p = pad2(w2, h1p, outp)
    b2p = pad2(b2, 1, outp)
    return (w0x, w0y, b0p, w1p, b1p, w2p, b2p), outp


# ------------------------------- forward ------------------------------------
def simple_occ_dense_net_forward(x, y_features, params, *, tile_b=256):
    """Pallas implementation of SimpleOccDenseNet.forward (no course embedding).

    x          : (B, x_horizon, x_feat)       float32
    y_features : (B, y_horizon, y_feat)       float32
    returns    : (B, y_size * y_horizon)      float32
    """
    # TODO(synk): bf16 MXU inputs (v6e/v7x) would halve activation bytes; kept
    # f32 here so the exact-precision reference check below stays tight.
    w0, b0, w1, b1, w2, b2 = params
    B = x.shape[0]
    x_flat = x.reshape(B, -1)
    y_flat = y_features.reshape(B, -1)
    x_size = x_flat.shape[1]
    out_dim = w2.shape[1]

    (w0x, w0y, b0p, w1p, b1p, w2p, b2p), outp = prepare_padded_params(params, x_size)

    # Batch tiling: tile must be a multiple of 8 sublanes; pad batch to tile.
    tb = min(tile_b, _round_up(B, 8))
    b_pad = _round_up(B, tb)
    if b_pad != B:
        x_flat = jnp.pad(x_flat, ((0, b_pad - B), (0, 0)))
        y_flat = jnp.pad(y_flat, ((0, b_pad - B), (0, 0)))

    grid = (b_pad // tb,)

    def act_spec(feat):
        return pl.BlockSpec((tb, feat), lambda i: (i, 0))

    def resident_spec(arr):
        return pl.BlockSpec(arr.shape, lambda i: (0, 0))

    out_padded = pl.pallas_call(
        mlp_kernel,
        out_shape=jax.ShapeDtypeStruct((b_pad, outp), jnp.float32),
        grid=grid,
        in_specs=[
            act_spec(x_flat.shape[1]),
            act_spec(y_flat.shape[1]),
            resident_spec(w0x),
            resident_spec(w0y),
            resident_spec(b0p),
            resident_spec(w1p),
            resident_spec(b1p),
            resident_spec(w2p),
            resident_spec(b2p),
        ],
        out_specs=pl.BlockSpec((tb, outp), lambda i: (i, 0)),
        compiler_params=pltpu.CompilerParams(
            dimension_semantics=("parallel",)),
    )(x_flat, y_flat, w0x, w0y, b0p, w1p, b1p, w2p, b2p)

    return out_padded[:B, :out_dim]


# --------------------------- parameter construction -------------------------
def init_linear(key, fan_in, fan_out):
    # Deterministic PyTorch-style init: U(-1/sqrt(fan_in), 1/sqrt(fan_in)).
    kw, kb = jax.random.split(key)
    bound = 1.0 / jnp.sqrt(float(fan_in))
    w = jax.random.uniform(kw, (fan_in, fan_out), jnp.float32, -bound, bound)
    b = jax.random.uniform(kb, (1, fan_out), jnp.float32, -bound, bound)
    return w, b


def reference_forward(x, y_features, params):
    # Pure-JAX reference of the same forward pass, for verification.
    w0, b0, w1, b1, w2, b2 = params
    B = x.shape[0]
    dot = functools.partial(jnp.dot, precision=lax.Precision.HIGHEST)
    inp = jnp.concatenate([x.reshape(B, -1), y_features.reshape(B, -1)], axis=1)
    h = jnp.maximum(dot(inp, w0) + b0, 0.0)
    h = jnp.maximum(dot(h, w1) + b1, 0.0)
    return dot(h, w2) + b2


# ----------------------------------- main ------------------------------------
if __name__ == "__main__":
    # Hyperparameters implied by the module (small, synthetic).
    batch_size = 2
    x_horizon = 8           # hyperparameters['x_horizon']
    x_feat = 4              # hyperparameters['x_size'] (per timestep)
    y_horizon = 4           # hyperparameters['y_horizon']
    y_feat = 3              # hyperparameters['y_features_size'] (per timestep)
    y_size = 1              # hyperparameters['y_size']
    hidden_size = [32, 32]  # len > 1 branch: two hidden layers + output layer

    x_size = x_feat * x_horizon                  # 32
    y_features_size = y_feat * y_horizon         # 12
    input_size = x_size + y_features_size        # 44 (enc_size = 0)
    output_size = y_size * y_horizon             # 4

    # Deterministic parameters.
    key = jax.random.PRNGKey(0)
    k_x, k_y, k_xb, k_yb, k0, k1, k2 = jax.random.split(key, 7)
    w0, b0 = init_linear(k0, input_size, hidden_size[0])      # input_layer
    w1, b1 = init_linear(k1, hidden_size[0], hidden_size[1])  # hidden_layer_0
    w2, b2 = init_linear(k2, hidden_size[1], output_size)     # output_layer
    params = (w0, b0, w1, b1, w2, b2)

    # Deterministic inputs (matching the forward signature's x, y_features).
    x = jax.random.normal(k_x, (batch_size, x_horizon, x_feat), jnp.float32)
    y_features = jax.random.normal(k_y, (batch_size, y_horizon, y_feat), jnp.float32)
    # TODO(synk): 'coursenumber' embedding branch needs an external helper json;
    # the embedding-free feature configuration is implemented here.

    out = simple_occ_dense_net_forward(x, y_features, params)
    out = jax.block_until_ready(out)
    ref = reference_forward(x, y_features, params)
    assert out.shape == (batch_size, output_size)
    assert jnp.allclose(out, ref, atol=1e-5, rtol=1e-5)

    # Larger batch to exercise the batch grid (grid > 1) and output slicing.
    big_b = 300
    xb = jax.random.normal(k_xb, (big_b, x_horizon, x_feat), jnp.float32)
    yb = jax.random.normal(k_yb, (big_b, y_horizon, y_feat), jnp.float32)
    out_b = jax.block_until_ready(simple_occ_dense_net_forward(xb, yb, params))
    ref_b = reference_forward(xb, yb, params)
    assert out_b.shape == (big_b, output_size)
    assert jnp.allclose(out_b, ref_b, atol=1e-5, rtol=1e-5)

    print("KERNEL_OK")
</pallas_src>

<mosaic_0001>
module attributes {stable_mosaic.version = 11 : i64} {
  func.func @mlp_kernel(%arg0: i32, %arg1: memref<8x32xf32, #tpu.memory_space<vmem>>, %arg2: memref<8x12xf32, #tpu.memory_space<vmem>>, %arg3: memref<32x128xf32, #tpu.memory_space<vmem>>, %arg4: memref<12x128xf32, #tpu.memory_space<vmem>>, %arg5: memref<1x128xf32, #tpu.memory_space<vmem>>, %arg6: memref<128x128xf32, #tpu.memory_space<vmem>>, %arg7: memref<1x128xf32, #tpu.memory_space<vmem>>, %arg8: memref<128x128xf32, #tpu.memory_space<vmem>>, %arg9: memref<1x128xf32, #tpu.memory_space<vmem>>, %arg10: memref<8x128xf32, #tpu.memory_space<vmem>>) attributes {dimension_semantics = [#tpu.dimension_semantics<parallel>], iteration_bounds = array<i64: 1>, scalar_prefetch = 0 : i64, scratch_operands = 0 : i64, tpu.core_type = #tpu.core_type<tc>, window_params = [{transform_indices = @transform_0, window_bounds = array<i64: 8, 32>}, {transform_indices = @transform_1, window_bounds = array<i64: 8, 12>}, {pipeline_mode = #tpu.pipeline_mode<synchronous>, transform_indices = @transform_2, window_bounds = array<i64: 32, 128>}, {pipeline_mode = #tpu.pipeline_mode<synchronous>, transform_indices = @transform_3, window_bounds = array<i64: 12, 128>}, {pipeline_mode = #tpu.pipeline_mode<synchronous>, transform_indices = @transform_4, window_bounds = array<i64: 1, 128>}, {pipeline_mode = #tpu.pipeline_mode<synchronous>, transform_indices = @transform_5, window_bounds = array<i64: 128, 128>}, {pipeline_mode = #tpu.pipeline_mode<synchronous>, transform_indices = @transform_6, window_bounds = array<i64: 1, 128>}, {pipeline_mode = #tpu.pipeline_mode<synchronous>, transform_indices = @transform_7, window_bounds = array<i64: 128, 128>}, {pipeline_mode = #tpu.pipeline_mode<synchronous>, transform_indices = @transform_8, window_bounds = array<i64: 1, 128>}, {transform_indices = @transform_9, window_bounds = array<i64: 8, 128>}]} {
    %c0 = arith.constant 0 : index
    %c0_0 = arith.constant 0 : index
    %0 = vector.load %arg1[%c0, %c0_0] : memref<8x32xf32, #tpu.memory_space<vmem>>, vector<8x32xf32>
    %c0_1 = arith.constant 0 : index
    %c0_2 = arith.constant 0 : index
    %1 = vector.load %arg3[%c0_1, %c0_2] : memref<32x128xf32, #tpu.memory_space<vmem>>, vector<32x128xf32>
    %cst = arith.constant dense<0.000000e+00> : vector<8x128xf32>
    %2 = tpu.matmul %0, %1, %cst {dimension_numbers = #tpu.dot_dimension_numbers<[1], [0], [0], [1], [0, 0, 1, 1], [], []>, precision = #tpu.contract_precision<fp32>} : vector<8x32xf32>, vector<32x128xf32>, vector<8x128xf32> -> vector<8x128xf32>
    %c0_3 = arith.constant 0 : index
    %c0_4 = arith.constant 0 : index
    %3 = vector.load %arg2[%c0_3, %c0_4] : memref<8x12xf32, #tpu.memory_space<vmem>>, vector<8x12xf32>
    %c0_5 = arith.constant 0 : index
    %c0_6 = arith.constant 0 : index
    %4 = vector.load %arg4[%c0_5, %c0_6] : memref<12x128xf32, #tpu.memory_space<vmem>>, vector<12x128xf32>
    %cst_7 = arith.constant dense<0.000000e+00> : vector<8x128xf32>
    %5 = tpu.matmul %3, %4, %cst_7 {dimension_numbers = #tpu.dot_dimension_numbers<[1], [0], [0], [1], [0, 0, 1, 1], [], []>, precision = #tpu.contract_precision<fp32>} : vector<8x12xf32>, vector<12x128xf32>, vector<8x128xf32> -> vector<8x128xf32>
    %6 = arith.addf %2, %5 : vector<8x128xf32>
    %c0_8 = arith.constant 0 : index
    %c0_9 = arith.constant 0 : index
    %7 = vector.load %arg5[%c0_8, %c0_9] : memref<1x128xf32, #tpu.memory_space<vmem>>, vector<1x128xf32>
    %8 = vector.broadcast %7 : vector<1x128xf32> to vector<8x128xf32>
    %9 = arith.addf %6, %8 : vector<8x128xf32>
    %cst_10 = arith.constant 0.000000e+00 : f32
    %10 = vector.broadcast %cst_10 : f32 to vector<8x128xf32>
    %11 = arith.maximumf %9, %10 : vector<8x128xf32>
    %c0_11 = arith.constant 0 : index
    %c0_12 = arith.constant 0 : index
    %12 = vector.load %arg6[%c0_11, %c0_12] : memref<128x128xf32, #tpu.memory_space<vmem>>, vector<128x128xf32>
    %cst_13 = arith.constant dense<0.000000e+00> : vector<8x128xf32>
    %13 = tpu.matmul %11, %12, %cst_13 {dimension_numbers = #tpu.dot_dimension_numbers<[1], [0], [0], [1], [0, 0, 1, 1], [], []>, precision = #tpu.contract_precision<fp32>} : vector<8x128xf32>, vector<128x128xf32>, vector<8x128xf32> -> vector<8x128xf32>
    %c0_14 = arith.constant 0 : index
    %c0_15 = arith.constant 0 : index
    %14 = vector.load %arg7[%c0_14, %c0_15] : memref<1x128xf32, #tpu.memory_space<vmem>>, vector<1x128xf32>
    %15 = vector.broadcast %14 : vector<1x128xf32> to vector<8x128xf32>
    %16 = arith.addf %13, %15 : vector<8x128xf32>
    %cst_16 = arith.constant 0.000000e+00 : f32
    %17 = vector.broadcast %cst_16 : f32 to vector<8x128xf32>
    %18 = arith.maximumf %16, %17 : vector<8x128xf32>
    %c0_17 = arith.constant 0 : index
    %c0_18 = arith.constant 0 : index
    %19 = vector.load %arg8[%c0_17, %c0_18] : memref<128x128xf32, #tpu.memory_space<vmem>>, vector<128x128xf32>
    %cst_19 = arith.constant dense<0.000000e+00> : vector<8x128xf32>
    %20 = tpu.matmul %18, %19, %cst_19 {dimension_numbers = #tpu.dot_dimension_numbers<[1], [0], [0], [1], [0, 0, 1, 1], [], []>, precision = #tpu.contract_precision<fp32>} : vector<8x128xf32>, vector<128x128xf32>, vector<8x128xf32> -> vector<8x128xf32>
    %c0_20 = arith.constant 0 : index
    %c0_21 = arith.constant 0 : index
    %21 = vector.load %arg9[%c0_20, %c0_21] : memref<1x128xf32, #tpu.memory_space<vmem>>, vector<1x128xf32>
    %22 = vector.broadcast %21 : vector<1x128xf32> to vector<8x128xf32>
    %23 = arith.addf %20, %22 : vector<8x128xf32>
    %c0_22 = arith.constant 0 : index
    %c0_23 = arith.constant 0 : index
    %24 = vector.load %arg10[%c0_22, %c0_23] : memref<8x128xf32, #tpu.memory_space<vmem>>, vector<8x128xf32>
    tpu.vector_store %arg10[%c0_22, %c0_23], %23 {strides = array<i32>} : memref<8x128xf32, #tpu.memory_space<vmem>>, vector<8x128xf32>,
    return
  }
  func.func @transform_0(%arg0: i32) -> (i32, i32) {
    %c0_i32 = arith.constant 0 : i32
    %c0_i32_0 = arith.constant 0 : i32
    return %arg0, %c0_i32 : i32, i32
  }
  func.func @transform_1(%arg0: i32) -> (i32, i32) {
    %c0_i32 = arith.constant 0 : i32
    %c0_i32_0 = arith.constant 0 : i32
    return %arg0, %c0_i32 : i32, i32
  }
  func.func @transform_2(%arg0: i32) -> (i32, i32) {
    %c0_i32 = arith.constant 0 : i32
    %c0_i32_0 = arith.constant 0 : i32
    %c0_i32_1 = arith.constant 0 : i32
    return %c0_i32, %c0_i32_0 : i32, i32
  }
  func.func @transform_3(%arg0: i32) -> (i32, i32) {
    %c0_i32 = arith.constant 0 : i32
    %c0_i32_0 = arith.constant 0 : i32
    %c0_i32_1 = arith.constant 0 : i32
    return %c0_i32, %c0_i32_0 : i32, i32
  }
  func.func @transform_4(%arg0: i32) -> (i32, i32) {
    %c0_i32 = arith.constant 0 : i32
    %c0_i32_0 = arith.constant 0 : i32
    %c0_i32_1 = arith.constant 0 : i32
    return %c0_i32, %c0_i32_0 : i32, i32
  }
  func.func @transform_5(%arg0: i32) -> (i32, i32) {
    %c0_i32 = arith.constant 0 : i32
    %c0_i32_0 = arith.constant 0 : i32
    %c0_i32_1 = arith.constant 0 : i32
    return %c0_i32, %c0_i32_0 : i32, i32
  }
  func.func @transform_6(%arg0: i32) -> (i32, i32) {
    %c0_i32 = arith.constant 0 : i32
    %c0_i32_0 = arith.constant 0 : i32
    %c0_i32_1 = arith.constant 0 : i32
    return %c0_i32, %c0_i32_0 : i32, i32
  }
  func.func @transform_7(%arg0: i32) -> (i32, i32) {
    %c0_i32 = arith.constant 0 : i32
    %c0_i32_0 = arith.constant 0 : i32
    %c0_i32_1 = arith.constant 0 : i32
    return %c0_i32, %c0_i32_0 : i32, i32
  }
  func.func @transform_8(%arg0: i32) -> (i32, i32) {
    %c0_i32 = arith.constant 0 : i32
    %c0_i32_0 = arith.constant 0 : i32
    %c0_i32_1 = arith.constant 0 : i32
    return %c0_i32, %c0_i32_0 : i32, i32
  }
  func.func @transform_9(%arg0: i32) -> (i32, i32) {
    %c0_i32 = arith.constant 0 : i32
    %c0_i32_0 = arith.constant 0 : i32
    return %arg0, %c0_i32 : i32, i32
  }
}

</mosaic_0001>

<bundles_post_ra>
// kernel: tpu_custom_call.1
= control target key start
LH: loop header
LB: loop body
LE: loop exit
PB: predicated region body
PF: predicated region fallthrough
CT: control target
= control target key end

     0   :  { %14 = vsyncpa [#allocation3], 0  ;;  %s2035_s0 = inlined_call_operand.hbm [shape: f32[8,32], index: 0, kind: input, shape index: {}]   ;;  %s2036_s1 = inlined_call_operand.hbm [shape: f32[8,12], index: 1, kind: input, shape index: {}]   ;;  %s2037_s2 = inlined_call_operand.hbm [shape: f32[32,128], index: 2, kind: input, shape index: {}]   ;;  %s2038_s3 = inlined_call_operand.hbm [shape: f32[12,128], index: 3, kind: input, shape index: {}]   ;;  %s2039_s4 = inlined_call_operand.vmem [shape: f32[1,128], index: 4, kind: input, shape index: {}]   ;;  %s2040_s5 = inlined_call_operand.hbm [shape: f32[128,128], index: 5, kind: input, shape index: {}]   ;;  %s2041_s6 = inlined_call_operand.vmem [shape: f32[1,128], index: 6, kind: input, shape index: {}]   ;;  %s2042_s7 = inlined_call_operand.hbm [shape: f32[128,128], index: 7, kind: input, shape index: {}]   ;;  %s2043_s8 = inlined_call_operand.vmem [shape: f32[1,128], index: 8, kind: input, shape index: {}]   ;;  %s2044_s9 = inlined_call_operand.hbm [shape: f32[8,128], index: 9, kind: output, shape index: {}]  }
   0x1   :  { %15 = vsyncpa [#allocation6], 0 }
   0x2   :  { %16 = vsyncpa [#allocation9], 0 }
   0x3   :  { %17 = vsyncpa [#allocation12], 0  ;;  %s35_s11 = sshll.u32 %s2036_s1, 4  ;;  %s36_s11 = int_to_ptr.hbm [resolvable:$true] %s35_s11 }
   0x4   :  { %18 = vsyncpa [#allocation4], 0  ;;  %s1427_s12 = smov [#allocation5]   ;;  %s58_s16 = sshll.u32 %s2038_s3, 4  ;;  %s59_s16 = int_to_ptr.hbm [resolvable:$true] %s58_s16 }
   0x5   :  { %s37_s13 = sshll.u32 %s1427_s12, 4  ;;  %s1428_s17 = smov [#allocation8]   ;;  %s38_s13 = int_to_ptr.vmem [resolvable:$true] %s37_s13 }
   0x6   :  { %40 = dma.hbm_to_vmem [thread:$0]  %s36_s11, 128, %s38_s13, [#allocation6]  }
   0x7   :  { %s60_s18 = sshll.u32 %s1428_s17, 4  ;;  %s24_s21 = sshll.u32 %s2035_s0, 4  ;;  %s61_s18 = int_to_ptr.vmem [resolvable:$true] %s60_s18  ;;  %s25_s21 = int_to_ptr.hbm [resolvable:$true] %s24_s21 }
   0x8   :  { %s1429_s1 = smov 128   ;;  %s1430_s22 = smov 8  }
   0x9   :  { %66 = dma.hbm_to_vmem [thread:$0]  %s59_s16, 256, %s61_s18, [#allocation9], %s1429_s1, %s1429_s1, %s1430_s22  }
   0xa   :  { %s45_s25 = sshll.u32 %s2037_s2, 4  ;;  %s1431_s26 = smov [#allocation2]   ;;  %s46_s25 = int_to_ptr.hbm [resolvable:$true] %s45_s25 }
   0xb   :  { %s26_s27 = sshll.u32 %s1431_s26, 4  ;;  %s1432_s3 = smov [#allocation7]   ;;  %s27_s27 = int_to_ptr.vmem [resolvable:$true] %s26_s27 }
   0xc   :  { %29 = dma.hbm_to_vmem [thread:$0]  %s25_s21, 128, %s27_s27, [#allocation3]  }
   0xd   :  { %s47_s28 = sshll.u32 %s1432_s3, 4  ;;  %s73_s0 = sshll.u32 %s2040_s5, 4  ;;  %s48_s28 = int_to_ptr.vmem [resolvable:$true] %s47_s28  ;;  %s74_s0 = int_to_ptr.hbm [resolvable:$true] %s73_s0 }
   0xe   :  { %53 = dma.hbm_to_vmem [thread:$0]  %s46_s25, 512, %s48_s28, [#allocation6], %s1429_s1, %s1429_s1, %s1430_s22  }
   0xf   :  { %s88_s12 = sshll.u32 %s2042_s7, 4  ;;  %s1433_s13 = smov [#allocation10]   ;;  %s89_s12 = int_to_ptr.hbm [resolvable:$true] %s88_s12 }
  0x10   :  { %s75_s2 = sshll.u32 %s1433_s13, 4  ;;  %s1434_s14 = smov [#allocation11]   ;;  %s76_s2 = int_to_ptr.vmem [resolvable:$true] %s75_s2 }
  0x11   :  { %81 = dma.hbm_to_vmem [thread:$0]  %s74_s0, 2048, %s76_s2, [#allocation9], %s1429_s1, %s1429_s1, %s1430_s22  }
  0x12   :  { %s90_s15 = sshll.u32 %s1434_s14, 4  ;;  %s91_s15 = int_to_ptr.vmem [resolvable:$true] %s90_s15 }
  0x13   :  { %96 = dma.hbm_to_vmem [thread:$0]  %s89_s12, 2048, %s91_s15, [#allocation12], %s1429_s1, %s1429_s1, %s1430_s22  }
  0x14   :  { %1417 = dma.done.wait [#allocation3], 128  }
  0x15   :  { %1418 = vsyncadd [#allocation3], 4294967168 }
  0x16   :  { %1419 = dma.done.wait [#allocation6], 640  }
  0x17   :  { %1420 = vsyncadd [#allocation6], 4294966656 }
  0x18   :  { %1421 = dma.done.wait [#allocation9], 2304  }
  0x19   :  { %1422 = vsyncadd [#allocation9], 4294964992 }
  0x1a   :  { %1423 = dma.done.wait [#allocation12], 2048  }
  0x1b   :  { %1424 = vsyncadd [#allocation12], 4294965248  ;;  %vm135_vm0 = vcmask 1043456   ;;  %vm131_vm1 = vcmask 97280   ;;  %v130_v0 = vld [vmem:[#allocation8 + $0x8] sm:$0xf] }
  0x1c   :  { %v129_v1 = vld [vmem:[#allocation8] sm:$0xff]  ;;  %v128_v2 = vld [vmem:[#allocation5] sm:$0xff]  ;;  %vm298_vm2 = vcmask 261120   ;;  %v137_v3 = vsel %vm135_vm0, %v130_v0, 0  ;;  %v126_v7 = vld [vmem:[#allocation7 + $0x10] sm:$0xff]  ;;  %s1435_s18 = smov [#allocation13]  }
  0x1d   :  { %v1504_v4 = vand.u32 4294901760, %v129_v1  ;;  %v133_v5 = vsel %vm131_vm1, %v128_v2, 0  ;;  %v127_v6 = vld [vmem:[#allocation7 + $0x18] sm:$0xff]  ;;  %v125_v8 = vld [vmem:[#allocation7 + $0x8] sm:$0xff]  ;;  %v1506_v9 = vand.u32 4294901760, %v137_v3  ;;  %v1512_v12 = vand.u32 4294901760, %v126_v7 }
  0x1e   :  { %v1508_v10 = vand.u32 4294901760, %v133_v5  ;;  %v1510_v11 = vand.u32 4294901760, %v127_v6  ;;  %v124_v13 = vld [vmem:[#allocation7] sm:$0xff]  ;;  %v123_v14 = vld [vmem:[#allocation2] sm:$0xff]  ;;  %v1515_v16 = vand.u32 4294901760, %v125_v8  ;;  %v508_v39 = vld [vmem:[#allocation10 + $0x78] sm:$0xff] }
  0x1f   :  { %v187_v15 = vsub.f32 %v129_v1, %v1504_v4  ;;  %v1517_v17 = vand.u32 4294901760, %v124_v13  ;;  %v300_v18 = vsel %vm298_vm2, %v123_v14, 0  ;;  %v181_v19 = vsub.f32 %v137_v3, %v1506_v9  ;;  %154 = vmatpush.msra.mxu0 %v1506_v9  ;;  %238 = vmatpush.msra.mxu3 %v1506_v9  ;;  %v507_v42 = vld [vmem:[#allocation10 + $0x70] sm:$0xff]  ;;  %v506_v49 = vld [vmem:[#allocation10 + $0x68] sm:$0xff]  ;;  %v505_v53 = vld [vmem:[#allocation10 + $0x60] sm:$0xff]  ;;  %s1222_s19 = sshll.u32 %s1435_s18, 4  ;;  %s1223_s19 = int_to_ptr.vmem [resolvable:$true] %s1222_s19 }
  0x20   :  { %v158_v20 = vsub.f32 %v133_v5, %v1508_v10  ;;  %v1525_v21 = vsub.f32 %v127_v6, %v1510_v11  ;;  %v1527_v22 = vand.u32 4294901760, %v300_v18  ;;  %v1530_v24 = vsub.f32 %v126_v7, %v1512_v12  ;;  %v504_v58 = vld [vmem:[#allocation10 + $0x58] sm:$0xff]  ;;  %v503_v62 = vld [vmem:[#allocation10 + $0x50] sm:$0xff]  ;;  %v502_v2 = vld [vmem:[#allocation10 + $0x48] sm:$0xff]  ;;  %s1224_s1 = sshll.u32 %s2044_s9, 4  ;;  %s1225_s1 = int_to_ptr.hbm [resolvable:$true] %s1224_s1 }
  0x21   :  { %v188_v23 = vand.u32 4294901760, %v187_v15  ;;  %v1533_v25 = vsub.f32 %v125_v8, %v1515_v16  ;;  %v1536_v26 = vsub.f32 %v124_v13, %v1517_v17  ;;  %213 = vmatpush.msra.mxu2 %v181_v19  ;;  %156 = vmatpush.msra.mxu0 %v1504_v4  ;;  %v182_v27 = vand.u32 4294901760, %v181_v19 }
  0x22   :  { %v159_v28 = vand.u32 4294901760, %v158_v20  ;;  %v345_v29 = vand.u32 4294901760, %v1525_v21  ;;  %v1541_v30 = vsub.f32 %v300_v18, %v1527_v22  ;;  %240 = vmatpush.msra.mxu3 %v1504_v4  ;;  %v351_v32 = vand.u32 4294901760, %v1530_v24 }
  0x23   :  { %v189_v31 = vsub.f32 %v187_v15, %v188_v23  ;;  %v357_v33 = vand.u32 4294901760, %v1533_v25  ;;  %v363_v34 = vand.u32 4294901760, %v1536_v26  ;;  %216 = vmatpush.msra.mxu2 %v187_v15  ;;  %v183_v35 = vsub.f32 %v181_v19, %v182_v27  ;;  %265 = vmatpush.msrb.mxu0 %v182_v27  ;;  %v500_v15 = vld [vmem:[#allocation10 + $0x38] sm:$0xff] }
  0x24   :  { %v160_v36 = vsub.f32 %v158_v20, %v159_v28  ;;  %244 = vmatmul.f32.vlgmr.msra.gmra.mxu3 %v159_v28  ;;  %v346_v37 = vsub.f32 %v1525_v21, %v345_v29  ;;  %v324_v38 = vand.u32 4294901760, %v1541_v30  ;;  %219 = vmatmul.f32.vlgmr.msra.gmra.mxu2 %v158_v20  ;;  %v352_v41 = vsub.f32 %v1530_v24, %v351_v32  ;;  %v499_v20 = vld [vmem:[#allocation10 + $0x30] sm:$0xff] }
  0x25   :  { %v190_v40 = vand.u32 4294901760, %v189_v31  ;;  %315 = vmatpush.msrb.mxu2 %v1510_v11  ;;  %v184_v43 = vand.u32 4294901760, %v183_v35  ;;  %v358_v46 = vsub.f32 %v1533_v25, %v357_v33  ;;  %269 = vmatpush.msrb.mxu0 %v188_v23  ;;  %v1559_v48 = vand.u32 4294901760, %v508_v39 }
  0x26   :  { %v161_v44 = vand.u32 4294901760, %v160_v36  ;;  %v347_v45 = vand.u32 4294901760, %v346_v37  ;;  %v325_v47 = vsub.f32 %v1541_v30, %v324_v38  ;;  %v353_v50 = vand.u32 4294901760, %v352_v41 }
  0x27   :  { %185 = vmatpush.msra.mxu1 %v184_v43  ;;  %v364_v51 = vsub.f32 %v1536_v26, %v363_v34  ;;  %v1564_v52 = vand.u32 4294901760, %v507_v42  ;;  %317 = vmatpush.msrb.mxu2 %v1512_v12  ;;  %v359_v54 = vand.u32 4294901760, %v358_v46  ;;  %v1569_v55 = vsub.f32 %v508_v39, %v1559_v48 }
  0x28   :  { %162 = vmatmul.f32.vlgmr.msra.gmra.mxu0 %v161_v44  ;;  %348 = vmatpush.msrb.mxu3 %v347_v45  ;;  %v1571_v56 = vand.u32 4294901760, %v506_v49  ;;  %v326_v57 = vand.u32 4294901760, %v325_v47  ;;  %v1579_v61 = vand.u32 4294901760, %v505_v53  ;;  %v1588_v1 = vand.u32 4294901760, %v504_v58 }
  0x29   :  { %191 = vmatpush.msra.mxu1 %v190_v40  ;;  %386 = vmatpush.msra.mxu0 %v1525_v21  ;;  %v365_v59 = vand.u32 4294901760, %v364_v51  ;;  %v1577_v60 = vsub.f32 %v507_v42, %v1564_v52  ;;  %v556_v63 = vand.u32 4294901760, %v1569_v55  ;;  %v1595_v6 = vand.u32 4294901760, %v503_v62 }
  0x2a   :  { %193 = vmatmul.f32.vlgmr.msra.gmra.mxu1 %v1508_v10  ;;  %319 = vmatpush.msrb.mxu2 %v1515_v16  ;;  %v1586_v0 = vsub.f32 %v506_v49, %v1571_v56  ;;  %v1593_v5 = vsub.f32 %v505_v53, %v1579_v61  ;;  %v1599_v7 = vand.u32 4294901760, %v502_v2  ;;  %v1609_v13 = vsub.f32 %v504_v58, %v1588_v1 }
  0x2b   :  { %290 = vmatpush.msrb.mxu1 %v1506_v9  ;;  %354 = vmatpush.msrb.mxu3 %v353_v50  ;;  %v562_v3 = vand.u32 4294901760, %v1577_v60  ;;  %v557_v8 = vsub.f32 %v1569_v55, %v556_v63  ;;  %v1623_v19 = vsub.f32 %v503_v62, %v1595_v6  ;;  %v1650_v31 = vand.u32 4294901760, %v499_v20 }
  0x2c   :  { %321 = vmatpush.msrb.mxu2 %v1517_v17  ;;  %389 = vmatpush.msra.mxu0 %v1530_v24  ;;  %v568_v9 = vand.u32 4294901760, %v1586_v0  ;;  %v574_v18 = vand.u32 4294901760, %v1593_v5  ;;  %v580_v24 = vand.u32 4294901760, %v1609_v13 }
  0x2d   :  { %360 = vmatpush.msrb.mxu3 %v359_v54  ;;  %292 = vmatpush.msrb.mxu1 %v1504_v4  ;;  %v501_v4 = vld [vmem:[#allocation10 + $0x40] sm:$0xff]  ;;  %v558_v21 = vand.u32 4294901760, %v557_v8  ;;  %v1672_v39 = vsub.f32 %v499_v20, %v1650_v31  ;;  %v496_v8 = vld [vmem:[#allocation10 + $0x18] sm:$0xff] }
  0x2e   :  { %327 = vmatmul.f32.vlgmr.msrb.gmra.mxu2 %v326_v57  ;;  %392 = vmatpush.msra.mxu0 %v1533_v25  ;;  %v1613_v14 = vand.u32 4294901760, %v501_v4  ;;  %v569_v23 = vsub.f32 %v1586_v0, %v568_v9  ;;  %v1637_v25 = vand.u32 4294901760, %v500_v15  ;;  %v575_v28 = vsub.f32 %v1593_v5, %v574_v18 }
  0x2f   :  { %415 = vmatpush.msra.mxu1 %v1510_v11  ;;  %366 = vmatpush.msrb.mxu3 %v365_v59  ;;  %v610_v45 = vand.u32 4294901760, %v1672_v39 }
  0x30   :  { %444 = vmatpush.msra.mxu2 %v345_v29  ;;  %271 = vmatmul.f32.vlgmr.msrb.gmra.mxu0 %v1508_v10  ;;  %v586_v29 = vand.u32 4294901760, %v1623_v19  ;;  %v1660_v35 = vsub.f32 %v500_v15, %v1637_v25  ;;  %v1738_v15 = vand.u32 4294901760, %v496_v8 }
  0x31   :  { %368 = vmatmul.f32.vlgmr.msrb.gmra.mxu3 %v1527_v22  ;;  %417 = vmatpush.msra.mxu1 %v1512_v12  ;;  %v611_v53 = vsub.f32 %v1672_v39, %v610_v45 }
  0x32   :  { %448 = vmatpush.msra.mxu2 %v351_v32  ;;  %475 = vmatpush.msra.mxu3 %v1510_v11  ;;  %v563_v11 = vsub.f32 %v1577_v60, %v562_v3  ;;  %v497_v32 = vld [vmem:[#allocation10 + $0x20] sm:$0xff]  ;;  %v587_v37 = vsub.f32 %v1623_v19, %v586_v29  ;;  %v604_v41 = vand.u32 4294901760, %v1660_v35  ;;  %v627_v20 = vsub.f32 %v496_v8, %v1738_v15 }
  0x33   :  { %294 = vmatmul.f32.vlgmr.msrb.gmra.mxu1 %v1508_v10  ;;  %395 = vmatpush.msra.mxu0 %v1536_v26  ;;  %v1628_v10 = vsub.f32 %v502_v2, %v1599_v7  ;;  %v498_v26 = vld [vmem:[#allocation10 + $0x28] sm:$0xff]  ;;  %v1674_v40 = vand.u32 4294901760, %v497_v32  ;;  %v612_v59 = vand.u32 4294901760, %v611_v53  ;;  %v863_v8 = vld [vmem:[#allocation11 + $0x40] sm:$0xff] }
  0x34   :  { %452 = vmatpush.msra.mxu2 %v357_v33  ;;  %477 = vmatpush.msra.mxu3 %v1512_v12  ;;  %v1642_v12 = vsub.f32 %v501_v4, %v1613_v14  ;;  %v564_v27 = vand.u32 4294901760, %v563_v11  ;;  %v570_v33 = vand.u32 4294901760, %v569_v23  ;;  %v1662_v36 = vand.u32 4294901760, %v498_v26  ;;  %v495_v11 = vld [vmem:[#allocation10 + $0x10] sm:$0xff]  ;;  %v494_v23 = vld [vmem:[#allocation10 + $0x8] sm:$0xff] }
  0x35   :  { %419 = vmatpush.msra.mxu1 %v1515_v16  ;;  %514 = vmatpush.msrb.mxu0 %v1559_v48  ;;  %v588_v43 = vand.u32 4294901760, %v587_v37  ;;  %v1694_v46 = vsub.f32 %v497_v32, %v1674_v40  ;;  %v605_v49 = vsub.f32 %v1660_v35, %v604_v41  ;;  %v493_v32 = vld [vmem:[#allocation10] sm:$0xff] }
  0x36   :  { %456 = vmatpush.msra.mxu2 %v363_v34  ;;  %479 = vmatpush.msra.mxu3 %v1515_v16  ;;  %v592_v16 = vand.u32 4294901760, %v1628_v10  ;;  %v581_v34 = vsub.f32 %v1609_v13, %v580_v24  ;;  %v1684_v42 = vsub.f32 %v498_v26, %v1662_v36  ;;  %v628_v26 = vand.u32 4294901760, %v627_v20 }
  0x37   :  { %458 = vmatmul.f32.vlgmr.msra.gmra.mxu2 %v1527_v22  ;;  %421 = vmatpush.msra.mxu1 %v1517_v17  ;;  %v622_v54 = vand.u32 4294901760, %v1694_v46  ;;  %v606_v57 = vand.u32 4294901760, %v605_v49  ;;  %v543_v37 = vand.u32 4294901760, %v493_v32 }
  0x38   :  { %481 = vmatpush.msra.mxu3 %v1517_v17  ;;  %398 = vmatmul.f32.vlgmr.msra.gmra.mxu0 %v1541_v30  ;;  %v598_v17 = vand.u32 4294901760, %v1642_v12  ;;  %v582_v30 = vand.u32 4294901760, %v581_v34  ;;  %v616_v50 = vand.u32 4294901760, %v1684_v42 }
  0x39   :  { %483 = vmatmul.f32.vlgmr.msra.gmra.mxu3 %v1527_v22  ;;  %559 = vmatpush.msrb.mxu1 %v558_v21  ;;  %v576_v22 = vand.u32 4294901760, %v575_v28  ;;  %v623_v62 = vsub.f32 %v1694_v46, %v622_v54  ;;  %v1741_v21 = vand.u32 4294901760, %v495_v11  ;;  %v1746_v28 = vand.u32 4294901760, %v494_v23 }
  0x3a   :  { %516 = vmatpush.msrb.mxu0 %v1564_v52  ;;  %657 = vmatpush.msrb.mxu2 %v1569_v55  ;;  %v599_v44 = vsub.f32 %v1642_v12, %v598_v17  ;;  %v617_v58 = vsub.f32 %v1684_v42, %v616_v50 }
  0x3b   :  { %425 = vmatmul.f32.vlgmr.msra.gmra.mxu1 %v324_v38  ;;  %710 = vmatpush.msrb.mxu3 %v1559_v48  ;;  %v593_v38 = vsub.f32 %v1628_v10, %v592_v16  ;;  %v624_v4 = vand.u32 4294901760, %v623_v62 }
  0x3c   :  { %565 = vmatpush.msrb.mxu1 %v564_v27  ;;  %518 = vmatpush.msrb.mxu0 %v1571_v56  ;;  %v600_v51 = vand.u32 4294901760, %v599_v44  ;;  %v618_v2 = vand.u32 4294901760, %v617_v58  ;;  %v633_v27 = vsub.f32 %v495_v11, %v1741_v21  ;;  %v645_v44 = vsub.f32 %v493_v32, %v543_v37 }
  0x3d   :  { %660 = vmatpush.msrb.mxu2 %v1577_v60  ;;  %712 = vmatpush.msrb.mxu3 %v1564_v52  ;;  %v594_v47 = vand.u32 4294901760, %v593_v38 }
  0x3e   :  { %571 = vmatpush.msrb.mxu1 %v570_v33  ;;  %520 = vmatpush.msrb.mxu0 %v1579_v61  ;;  %v629_v33 = vsub.f32 %v627_v20, %v628_v26  ;;  %v634_v34 = vand.u32 4294901760, %v633_v27 }
  0x3f   :  { %663 = vmatpush.msrb.mxu2 %v1586_v0  ;;  %714 = vmatpush.msrb.mxu3 %v1571_v56 }
  0x40   :  { %577 = vmatpush.msrb.mxu1 %v576_v22  ;;  %522 = vmatpush.msrb.mxu0 %v1588_v1  ;;  %v639_v22 = vsub.f32 %v494_v23, %v1746_v28  ;;  %v635_v38 = vsub.f32 %v633_v27, %v634_v34  ;;  %v1246_v23 = vld [vmem:[%s2039_s4] ss:$0 sm:$0xff] }
  0x41   :  { %666 = vmatpush.msrb.mxu2 %v1593_v5  ;;  %716 = vmatpush.msrb.mxu3 %v1579_v61 }
  0x42   :  { %583 = vmatpush.msrb.mxu1 %v582_v30  ;;  %524 = vmatpush.msrb.mxu0 %v1595_v6  ;;  %v630_v30 = vand.u32 4294901760, %v629_v33 }
  0x43   :  { %669 = vmatpush.msrb.mxu2 %v1609_v13  ;;  %718 = vmatpush.msrb.mxu3 %v1588_v1 }
  0x44   :  { %589 = vmatpush.msrb.mxu1 %v588_v43  ;;  %526 = vmatpush.msrb.mxu0 %v1599_v7  ;;  %v640_v43 = vand.u32 4294901760, %v639_v22 }
  0x45   :  { %672 = vmatpush.msrb.mxu2 %v1623_v19  ;;  %720 = vmatpush.msrb.mxu3 %v1595_v6  ;;  %v869_v19 = vld [vmem:[#allocation11 + $0x70] sm:$0xff] }
  0x46   :  { %595 = vmatpush.msrb.mxu1 %v594_v47  ;;  %528 = vmatpush.msrb.mxu0 %v1613_v14  ;;  %v636_v47 = vand.u32 4294901760, %v635_v38  ;;  %v641_v49 = vsub.f32 %v639_v22, %v640_v43 }
  0x47   :  { %675 = vmatpush.msrb.mxu2 %v1628_v10  ;;  %722 = vmatpush.msrb.mxu3 %v1599_v7  ;;  %v868_v10 = vld [vmem:[#allocation11 + $0x68] sm:$0xff] }
  0x48   :  { %601 = vmatpush.msrb.mxu1 %v600_v51  ;;  %530 = vmatpush.msrb.mxu0 %v1637_v25  ;;  %v646_v51 = vand.u32 4294901760, %v645_v44  ;;  %v642_v53 = vand.u32 4294901760, %v641_v49 }
  0x49   :  { %678 = vmatpush.msrb.mxu2 %v1642_v12  ;;  %724 = vmatpush.msrb.mxu3 %v1613_v14  ;;  %v1794_v12 = vand.u32 4294901760, %v869_v19 }
  0x4a   :  { %607 = vmatpush.msrb.mxu1 %v606_v57  ;;  %532 = vmatpush.msrb.mxu0 %v1650_v31  ;;  %v647_v57 = vsub.f32 %v645_v44, %v646_v51 }
  0x4b   :  { %681 = vmatpush.msrb.mxu2 %v1660_v35  ;;  %726 = vmatpush.msrb.mxu3 %v1637_v25  ;;  %v865_v35 = vld [vmem:[#allocation11 + $0x50] sm:$0xff] }
  0x4c   :  { %613 = vmatpush.msrb.mxu1 %v612_v59  ;;  %534 = vmatpush.msrb.mxu0 %v1662_v36  ;;  %v648_v58 = vand.u32 4294901760, %v647_v57 }
  0x4d   :  { %684 = vmatpush.msrb.mxu2 %v1672_v39  ;;  %728 = vmatpush.msrb.mxu3 %v1650_v31 }
  0x4e   :  { %619 = vmatpush.msrb.mxu1 %v618_v2  ;;  %536 = vmatpush.msrb.mxu0 %v1674_v40 }
  0x4f   :  { %687 = vmatpush.msrb.mxu2 %v1684_v42  ;;  %730 = vmatpush.msrb.mxu3 %v1662_v36 }
  0x50   :  { %625 = vmatpush.msrb.mxu1 %v624_v4  ;;  %538 = vmatpush.msrb.mxu0 %v1738_v15 }
  0x51   :  { %690 = vmatpush.msrb.mxu2 %v1694_v46  ;;  %732 = vmatpush.msrb.mxu3 %v1674_v40  ;;  %v1808_v46 = vsub.f32 %v869_v19, %v1794_v12  ;;  %v857_v19 = vld [vmem:[#allocation11 + $0x10] sm:$0xff] }
  0x52   :  { %540 = vmatpush.msrb.mxu0 %v1741_v21  ;;  %631 = vmatpush.msrb.mxu1 %v630_v30 }
  0x53   :  { %734 = vmatpush.msrb.mxu3 %v1738_v15  ;;  %693 = vmatpush.msrb.mxu2 %v627_v20  ;;  %v924_v20 = vand.u32 4294901760, %v1808_v46 }
  0x54   :  { %542 = vmatpush.msrb.mxu0 %v1746_v28  ;;  %637 = vmatpush.msrb.mxu1 %v636_v47  ;;  %v861_v47 = vld [vmem:[#allocation11 + $0x30] sm:$0xff] }
  0x55   :  { %736 = vmatpush.msrb.mxu3 %v1741_v21  ;;  %696 = vmatpush.msrb.mxu2 %v633_v27 }
  0x56   :  { %544 = vmatpush.msrb.mxu0 %v543_v37  ;;  %643 = vmatpush.msrb.mxu1 %v642_v53  ;;  %v860_v53 = vld [vmem:[#allocation11 + $0x28] sm:$0xff] }
  0x57   :  { %738 = vmatpush.msrb.mxu3 %v1746_v28  ;;  %699 = vmatpush.msrb.mxu2 %v639_v22 }
  0x58   :  { %751 = vmatpush.msra.mxu0 %v556_v63  ;;  %649 = vmatpush.msrb.mxu1 %v648_v58 }
  0x59   :  { %740 = vmatpush.msrb.mxu3 %v543_v37  ;;  %702 = vmatpush.msrb.mxu2 %v645_v44  ;;  %v862_v44 = vld [vmem:[#allocation11 + $0x38] sm:$0xff] }
  0x5a   :  { %755 = vmatpush.msra.mxu0 %v562_v3  ;;  %818 = vmatpush.msra.mxu1 %v1559_v48 }
  0x5c   :  { %759 = vmatpush.msra.mxu0 %v568_v9  ;;  %820 = vmatpush.msra.mxu1 %v1564_v52 }
  0x5e   :  { %763 = vmatpush.msra.mxu0 %v574_v18  ;;  %822 = vmatpush.msra.mxu1 %v1571_v56  ;;  %v870_v18 = vld [vmem:[#allocation11 + $0x78] sm:$0xff] }
  0x60   :  { %767 = vmatpush.msra.mxu0 %v580_v24  ;;  %824 = vmatpush.msra.mxu1 %v1579_v61 }
  0x62   :  { %771 = vmatpush.msra.mxu0 %v586_v29  ;;  %826 = vmatpush.msra.mxu1 %v1588_v1  ;;  %v1796_v29 = vand.u32 4294901760, %v868_v10 }
  0x64   :  { %775 = vmatpush.msra.mxu0 %v592_v16  ;;  %828 = vmatpush.msra.mxu1 %v1595_v6  ;;  %v866_v16 = vld [vmem:[#allocation11 + $0x58] sm:$0xff] }
  0x65   :  { %v1800_v39 = vand.u32 4294901760, %v866_v16 }
  0x66   :  { %779 = vmatpush.msra.mxu0 %v598_v17  ;;  %830 = vmatpush.msra.mxu1 %v1599_v7 }
  0x67   :  { %v1818_v62 = vsub.f32 %v866_v16, %v1800_v39 }
  0x68   :  { %783 = vmatpush.msra.mxu0 %v604_v41  ;;  %832 = vmatpush.msra.mxu1 %v1613_v14  ;;  %v864_v41 = vld [vmem:[#allocation11 + $0x48] sm:$0xff] }
  0x69   :  { %v1823_v4 = vand.u32 4294901760, %v864_v41  ;;  %v942_v27 = vand.u32 4294901760, %v1818_v62 }
  0x6a   :  { %787 = vmatpush.msra.mxu0 %v610_v45  ;;  %834 = vmatpush.msra.mxu1 %v1637_v25  ;;  %v1792_v25 = vand.u32 4294901760, %v870_v18 }
  0x6b   :  { %v943_v58 = vsub.f32 %v1818_v62, %v942_v27 }
  0x6c   :  { %791 = vmatpush.msra.mxu0 %v616_v50  ;;  %836 = vmatpush.msra.mxu1 %v1650_v31  ;;  %v867_v31 = vld [vmem:[#allocation11 + $0x60] sm:$0xff]  ;;  %v1805_v45 = vsub.f32 %v870_v18, %v1792_v25  ;;  %v1811_v50 = vsub.f32 %v868_v10, %v1796_v29 }
  0x6d   :  { %v1798_v17 = vand.u32 4294901760, %v867_v31  ;;  %876 = vmatpush.msra.mxu2 %v1792_v25  ;;  %v944_v10 = vand.u32 4294901760, %v943_v58 }
  0x6e   :  { %795 = vmatpush.msra.mxu0 %v622_v54  ;;  %838 = vmatpush.msra.mxu1 %v1662_v36  ;;  %v918_v11 = vand.u32 4294901760, %v1805_v45 }
  0x6f   :  { %v1815_v59 = vsub.f32 %v867_v31, %v1798_v17  ;;  %878 = vmatpush.msra.mxu2 %v1794_v12 }
  0x70   :  { %799 = vmatpush.msra.mxu0 %v628_v26  ;;  %840 = vmatpush.msra.mxu1 %v1674_v40  ;;  %v1802_v40 = vand.u32 4294901760, %v865_v35  ;;  %v919_v33 = vsub.f32 %v1805_v45, %v918_v11 }
  0x71   :  { %v936_v26 = vand.u32 4294901760, %v1815_v59  ;;  %880 = vmatpush.msra.mxu2 %v1796_v29 }
  0x72   :  { %803 = vmatpush.msra.mxu0 %v634_v34  ;;  %842 = vmatpush.msra.mxu1 %v1738_v15  ;;  %v1821_v2 = vsub.f32 %v865_v35, %v1802_v40  ;;  %v925_v34 = vsub.f32 %v1808_v46, %v924_v20  ;;  %v920_v49 = vand.u32 4294901760, %v919_v33 }
  0x73   :  { %v937_v38 = vsub.f32 %v1815_v59, %v936_v26  ;;  %882 = vmatpush.msra.mxu2 %v1798_v17 }
  0x74   :  { %807 = vmatpush.msra.mxu0 %v640_v43  ;;  %844 = vmatpush.msra.mxu1 %v1741_v21  ;;  %v930_v21 = vand.u32 4294901760, %v1811_v50  ;;  %v948_v43 = vand.u32 4294901760, %v1821_v2 }
  0x75   :  { %921 = vmatpush.msra.mxu3 %v920_v49  ;;  %884 = vmatpush.msra.mxu2 %v1800_v39 }
  0x76   :  { %811 = vmatpush.msra.mxu0 %v646_v51  ;;  %846 = vmatpush.msra.mxu1 %v1746_v28  ;;  %v1835_v28 = vsub.f32 %v864_v41, %v1823_v4  ;;  %v931_v22 = vsub.f32 %v1811_v50, %v930_v21  ;;  %v926_v51 = vand.u32 4294901760, %v925_v34  ;;  %v856_v41 = vld [vmem:[#allocation11 + $0x8] sm:$0xff] }
  0x77   :  { %886 = vmatpush.msra.mxu2 %v1802_v40 }
  0x78   :  { %848 = vmatpush.msra.mxu1 %v543_v37  ;;  %v1847_v37 = vand.u32 4294901760, %v863_v8  ;;  %927 = vmatpush.msra.mxu3 %v926_v51 }
  0x79   :  { %888 = vmatpush.msra.mxu2 %v1823_v4 }
  0x7b   :  { %890 = vmatpush.msra.mxu2 %v1847_v37 }
  0xa5   :  { %v163_v48 = vpop.f32.mrf.mxu0 }
  0xa7   :  { %v194_v52 = vpop.f32.mrf.mxu1  ;;  %v220_v55 = vpop.f32.mrf.mxu2 }
  0xa8   :  { %v195_v56 = vadd.f32 %v194_v52, %v163_v48  ;;  %v245_v60 = vpop.f32.mrf.mxu3  ;;  %v954_v48 = vand.u32 4294901760, %v1835_v28  ;;  %v859_v52 = vld [vmem:[#allocation11 + $0x20] sm:$0xff] }
  0xaa   :  { %v221_v61 = vadd.f32 %v220_v55, %v195_v56  ;;  %v932_v55 = vand.u32 4294901760, %v931_v22  ;;  %v1859_v56 = vsub.f32 %v863_v8, %v1847_v37  ;;  %v955_v18 = vsub.f32 %v1835_v28, %v954_v48 }
  0xac   :  { %v246_v63 = vadd.f32 %v245_v60, %v221_v61  ;;  %v1862_v60 = vand.u32 4294901760, %v862_v44  ;;  %v1864_v61 = vand.u32 4294901760, %v861_v47  ;;  %933 = vmatpush.msra.mxu3 %v932_v55 }
  0xad   :  { %v272_v0 = vpop.f32.mrf.mxu0 }
  0xae   :  { %v273_v1 = vadd.f32 %v272_v0, %v246_v63  ;;  %v938_v0 = vand.u32 4294901760, %v937_v38  ;;  %892 = vmatpush.msra.mxu2 %v1862_v60 }
  0xb0   :  { %v295_v3 = vpop.f32.mrf.mxu1  ;;  %939 = vmatpush.msra.mxu3 %v938_v0  ;;  %894 = vmatpush.msra.mxu2 %v1864_v61 }
  0xb1   :  { %v296_v5 = vadd.f32 %v295_v3, %v273_v1  ;;  %v328_v6 = vpop.f32.mrf.mxu2  ;;  %v949_v1 = vsub.f32 %v1821_v2, %v948_v43  ;;  %v1869_v3 = vand.u32 4294901760, %v860_v53 }
  0xb2   :  { %945 = vmatpush.msra.mxu3 %v944_v10 }
  0xb3   :  { %v329_v7 = vadd.f32 %v328_v6, %v296_v5  ;;  %v858_v5 = vld [vmem:[#allocation11 + $0x18] sm:$0xff]  ;;  %v960_v6 = vand.u32 4294901760, %v1859_v56  ;;  %v1889_v31 = vsub.f32 %v860_v53, %v1869_v3  ;;  %896 = vmatpush.msra.mxu2 %v1869_v3 }
  0xb4   :  { %v369_v9 = vpop.f32.mrf.mxu3  ;;  %v1891_v16 = vand.u32 4294901760, %v858_v5 }
  0xb5   :  { %v370_v13 = vadd.f32 %v369_v9, %v329_v7  ;;  %v399_v14 = vpop.f32.mrf.mxu0  ;;  %v1873_v7 = vsub.f32 %v862_v44, %v1862_v60  ;;  %v1877_v9 = vsub.f32 %v861_v47, %v1864_v61  ;;  %v978_v34 = vand.u32 4294901760, %v1889_v31 }
  0xb6   :  { %v1912_v22 = vsub.f32 %v858_v5, %v1891_v16 }
  0xb7   :  { %v400_v24 = vadd.f32 %v399_v14, %v370_v13  ;;  %v1879_v13 = vand.u32 4294901760, %v859_v52  ;;  %v979_v58 = vsub.f32 %v1889_v31, %v978_v34 }
  0xb8   :  { %v426_v36 = vpop.f32.mrf.mxu1 }
  0xb9   :  { %v427_v42 = vadd.f32 %v426_v36, %v400_v24  ;;  %v966_v24 = vand.u32 4294901760, %v1873_v7  ;;  %v950_v36 = vand.u32 4294901760, %v949_v1  ;;  %v1901_v8 = vsub.f32 %v859_v52, %v1879_v13  ;;  %898 = vmatpush.msra.mxu2 %v1879_v13 }
  0xba   :  { %v459_v54 = vpop.f32.mrf.mxu2  ;;  %v990_v52 = vand.u32 4294901760, %v1912_v22  ;;  %v980_v5 = vand.u32 4294901760, %v979_v58 }
  0xbb   :  { %v460_v15 = vadd.f32 %v459_v54, %v427_v42  ;;  %v961_v42 = vsub.f32 %v1859_v56, %v960_v6  ;;  %v972_v54 = vand.u32 4294901760, %v1877_v9  ;;  %v967_v33 = vsub.f32 %v1873_v7, %v966_v24  ;;  %951 = vmatpush.msra.mxu3 %v950_v36  ;;  %900 = vmatpush.msra.mxu2 %v1891_v16 }
  0xbc   :  { %v484_v32 = vpop.f32.mrf.mxu3  ;;  %v984_v49 = vand.u32 4294901760, %v1901_v8 }
  0xbd   :  { %v485_v30 = vadd.f32 %v484_v32, %v460_v15  ;;  %v1903_v15 = vand.u32 4294901760, %v857_v19  ;;  %v956_v32 = vand.u32 4294901760, %v955_v18  ;;  %v962_v44 = vand.u32 4294901760, %v961_v42 }
  0xbe   :  { %v973_v47 = vsub.f32 %v1877_v9, %v972_v54  ;;  %v985_v0 = vsub.f32 %v1901_v8, %v984_v49  ;;  %v991_v18 = vsub.f32 %v1912_v22, %v990_v52 }
  0xbf   :  { %v491_v57 = vadd.f32 %v1246_v23, %v485_v30  ;;  %v1914_v30 = vand.u32 4294901760, %v856_v41  ;;  %v1923_v51 = vsub.f32 %v857_v19, %v1903_v15  ;;  %957 = vmatpush.msra.mxu3 %v956_v32  ;;  %902 = vmatpush.msra.mxu2 %v1903_v15 }
  0xc0   :  { %v986_v10 = vand.u32 4294901760, %v985_v0  ;;  %v992_v36 = vand.u32 4294901760, %v991_v18 }
  0xc1   :  { %v492_v63 = vmax.f32 %v491_v57, 0.0  ;;  %v968_v57 = vand.u32 4294901760, %v967_v33  ;;  %v1932_v55 = vsub.f32 %v856_v41, %v1914_v30  ;;  %963 = vmatpush.msra.mxu3 %v962_v44  ;;  %v996_v1 = vand.u32 4294901760, %v1923_v51  ;;  %904 = vmatpush.msra.mxu2 %v1914_v30 }
  0xc3   :  { %v1881_v14 = vand.u32 4294901760, %v492_v63  ;;  %969 = vmatpush.msra.mxu3 %v968_v57  ;;  %v1002_v19 = vand.u32 4294901760, %v1932_v55 }
  0xc5   :  { %v546_v35 = vsub.f32 %v492_v63, %v1881_v14  ;;  %651 = vmatmul.f32.vlgmr.msrb.gmra.mxu1 %v1881_v14  ;;  %v974_v63 = vand.u32 4294901760, %v973_v47  ;;  %v1003_v41 = vsub.f32 %v1932_v55, %v1002_v19 }
  0xc6   :  { %1072 = vmatpush.msrb.mxu1 %v1792_v25 }
  0xc7   :  { %705 = vmatmul.f32.vlgmr.msrb.gmra.mxu2 %v546_v35  ;;  %v547_v23 = vand.u32 4294901760, %v546_v35  ;;  %975 = vmatpush.msra.mxu3 %v974_v63 }
  0xc8   :  { %1074 = vmatpush.msrb.mxu1 %v1794_v12 }
  0xc9   :  { %744 = vmatmul.f32.vlgmr.msrb.gmra.mxu3 %v547_v23  ;;  %v548_v38 = vsub.f32 %v546_v35, %v547_v23  ;;  %v997_v35 = vsub.f32 %v1923_v51, %v996_v1  ;;  %v1004_v23 = vand.u32 4294901760, %v1003_v41 }
  0xca   :  { %1076 = vmatpush.msrb.mxu1 %v1796_v29  ;;  %981 = vmatpush.msra.mxu3 %v980_v5 }
  0xcb   :  { %v549_v53 = vand.u32 4294901760, %v548_v38  ;;  %v998_v42 = vand.u32 4294901760, %v997_v35 }
  0xcc   :  { %1078 = vmatpush.msrb.mxu1 %v1798_v17  ;;  %987 = vmatpush.msra.mxu3 %v986_v10 }
  0xcd   :  { %550 = vmatmul.f32.vlgmr.msrb.gmra.mxu0 %v549_v53  ;;  %850 = vmatmul.f32.vlgmr.msra.gmra.mxu1 %v1881_v14 }
  0xce   :  { %1019 = vmatpush.msrb.mxu0 %v1805_v45  ;;  %1080 = vmatpush.msrb.mxu1 %v1800_v39 }
  0xcf   :  { %993 = vmatpush.msra.mxu3 %v992_v36 }
  0xd0   :  { %1022 = vmatpush.msrb.mxu0 %v1808_v46  ;;  %1082 = vmatpush.msrb.mxu1 %v1802_v40 }
  0xd1   :  { %999 = vmatpush.msra.mxu3 %v998_v42 }
  0xd2   :  { %1025 = vmatpush.msrb.mxu0 %v1811_v50  ;;  %1084 = vmatpush.msrb.mxu1 %v1823_v4 }
  0xd3   :  { %1005 = vmatpush.msra.mxu3 %v1004_v23 }
  0xd4   :  { %1028 = vmatpush.msrb.mxu0 %v1815_v59  ;;  %1086 = vmatpush.msrb.mxu1 %v1847_v37 }
  0xd5   :  { %813 = vmatmul.f32.vlgmr.msra.gmra.mxu0 %v1881_v14  ;;  %v855_v14 = vld [vmem:[#allocation11] sm:$0xff] }
  0xd6   :  { %1031 = vmatpush.msrb.mxu0 %v1818_v62  ;;  %1088 = vmatpush.msrb.mxu1 %v1862_v60  ;;  %v905_v32 = vand.u32 4294901760, %v855_v14 }
  0xd8   :  { %1034 = vmatpush.msrb.mxu0 %v1821_v2  ;;  %1090 = vmatpush.msrb.mxu1 %v1864_v61  ;;  %v1007_v33 = vsub.f32 %v855_v14, %v905_v32 }
  0xd9   :  { %906 = vmatpush.msra.mxu2 %v905_v32 }
  0xda   :  { %1037 = vmatpush.msrb.mxu0 %v1835_v28  ;;  %1092 = vmatpush.msrb.mxu1 %v1869_v3  ;;  %v1008_v38 = vand.u32 4294901760, %v1007_v33 }
  0xdb   :  { %1113 = vmatpush.msrb.mxu2 %v918_v11 }
  0xdc   :  { %1040 = vmatpush.msrb.mxu0 %v1859_v56  ;;  %1094 = vmatpush.msrb.mxu1 %v1879_v13  ;;  %v1009_v44 = vsub.f32 %v1007_v33, %v1008_v38 }
  0xdd   :  { %1117 = vmatpush.msrb.mxu2 %v924_v20 }
  0xde   :  { %1043 = vmatpush.msrb.mxu0 %v1873_v7  ;;  %1096 = vmatpush.msrb.mxu1 %v1891_v16  ;;  %v1010_v47 = vand.u32 4294901760, %v1009_v44 }
  0xdf   :  { %1121 = vmatpush.msrb.mxu2 %v930_v21 }
  0xe0   :  { %1046 = vmatpush.msrb.mxu0 %v1877_v9  ;;  %1098 = vmatpush.msrb.mxu1 %v1903_v15 }
  0xe1   :  { %1125 = vmatpush.msrb.mxu2 %v936_v26  ;;  %1011 = vmatpush.msra.mxu3 %v1010_v47 }
  0xe2   :  { %1049 = vmatpush.msrb.mxu0 %v1889_v31  ;;  %1100 = vmatpush.msrb.mxu1 %v1914_v30 }
  0xe3   :  { %1180 = vmatpush.msrb.mxu3 %v1792_v25  ;;  %1129 = vmatpush.msrb.mxu2 %v942_v27  ;;  %v1247_v25 = vld [vmem:[%s2041_s6] ss:$0 sm:$0xff] }
  0xe4   :  { %1052 = vmatpush.msrb.mxu0 %v1901_v8  ;;  %1102 = vmatpush.msrb.mxu1 %v905_v32 }
  0xe5   :  { %1182 = vmatpush.msrb.mxu3 %v1794_v12  ;;  %1133 = vmatpush.msrb.mxu2 %v948_v43 }
  0xe6   :  { %1055 = vmatpush.msrb.mxu0 %v1912_v22 }
  0xe7   :  { %1184 = vmatpush.msrb.mxu3 %v1796_v29  ;;  %1137 = vmatpush.msrb.mxu2 %v954_v48 }
  0xe8   :  { %1058 = vmatpush.msrb.mxu0 %v1923_v51 }
  0xe9   :  { %1186 = vmatpush.msrb.mxu3 %v1798_v17  ;;  %1141 = vmatpush.msrb.mxu2 %v960_v6 }
  0xea   :  { %1061 = vmatpush.msrb.mxu0 %v1932_v55 }
  0xeb   :  { %1188 = vmatpush.msrb.mxu3 %v1800_v39  ;;  %1145 = vmatpush.msrb.mxu2 %v966_v24 }
  0xec   :  { %1064 = vmatpush.msrb.mxu0 %v1007_v33 }
  0xed   :  { %1190 = vmatpush.msrb.mxu3 %v1802_v40  ;;  %1149 = vmatpush.msrb.mxu2 %v972_v54 }
  0xef   :  { %1192 = vmatpush.msrb.mxu3 %v1823_v4  ;;  %1153 = vmatpush.msrb.mxu2 %v978_v34 }
  0xf1   :  { %1194 = vmatpush.msrb.mxu3 %v1847_v37  ;;  %1157 = vmatpush.msrb.mxu2 %v984_v49  ;;  %v1248_v37 = vld [vmem:[%s2043_s8] ss:$0 sm:$0xff] }
  0xf3   :  { %1196 = vmatpush.msrb.mxu3 %v1862_v60  ;;  %1161 = vmatpush.msrb.mxu2 %v990_v52 }
  0xf5   :  { %1198 = vmatpush.msrb.mxu3 %v1864_v61  ;;  %1165 = vmatpush.msrb.mxu2 %v996_v1 }
  0xf7   :  { %1200 = vmatpush.msrb.mxu3 %v1869_v3  ;;  %1169 = vmatpush.msrb.mxu2 %v1002_v19 }
  0xf9   :  { %1202 = vmatpush.msrb.mxu3 %v1879_v13  ;;  %1173 = vmatpush.msrb.mxu2 %v1008_v38 }
  0xfb   :  { %1204 = vmatpush.msrb.mxu3 %v1891_v16 }
  0xfd   :  { %1206 = vmatpush.msrb.mxu3 %v1903_v15 }
  0xff   :  { %1208 = vmatpush.msrb.mxu3 %v1914_v30 }
 0x101   :  { %1210 = vmatpush.msrb.mxu3 %v905_v32 }
 0x142   :  { %v652_v12 = vpop.f32.mrf.mxu1 }
 0x14a   :  { %v551_v29 = vpop.f32.mrf.mxu0  ;;  %v706_v40 = vpop.f32.mrf.mxu2 }
 0x14b   :  { %v552_v17 = vadd.f32 %v1247_v25, %v551_v29  ;;  %v851_v2 = vpop.f32.mrf.mxu1 }
 0x14c   :  { %v745_v46 = vpop.f32.mrf.mxu3 }
 0x14d   :  { %v653_v39 = vadd.f32 %v652_v12, %v552_v17 }
 0x14f   :  { %v707_v45 = vadd.f32 %v706_v40, %v653_v39 }
 0x151   :  { %v746_v50 = vadd.f32 %v745_v46, %v707_v45 }
 0x152   :  { %v814_v59 = vpop.f32.mrf.mxu0 }
 0x153   :  { %v815_v62 = vadd.f32 %v814_v59, %v746_v50 }
 0x155   :  { %v852_v4 = vadd.f32 %v851_v2, %v815_v62 }
 0x157   :  { %v854_v11 = vmax.f32 %v852_v4, 0.0 }
 0x159   :  { %v907_v20 = vand.u32 4294901760, %v854_v11 }
 0x15b   :  { %v908_v21 = vsub.f32 %v854_v11, %v907_v20  ;;  %1013 = vmatmul.f32.vlgmr.msra.gmra.mxu3 %v907_v20 }
 0x15d   :  { %1067 = vmatmul.f32.vlgmr.msrb.gmra.mxu0 %v908_v21  ;;  %v909_v26 = vand.u32 4294901760, %v908_v21 }
 0x15f   :  { %1106 = vmatmul.f32.vlgmr.msrb.gmra.mxu1 %v909_v26  ;;  %v910_v27 = vsub.f32 %v908_v21, %v909_v26 }
 0x161   :  { %v911_v28 = vand.u32 4294901760, %v910_v27 }
 0x163   :  { %912 = vmatmul.f32.vlgmr.msra.gmra.mxu2 %v911_v28  ;;  %1212 = vmatmul.f32.vlgmr.msrb.gmra.mxu3 %v907_v20 }
 0x16b   :  { %1175 = vmatmul.f32.vlgmr.msrb.gmra.mxu2 %v907_v20 }
 0x1da   :  { %v1068_v61 = vpop.f32.mrf.mxu0 }
 0x1dc   :  { %v1107_v6 = vpop.f32.mrf.mxu1 }
 0x1de   :  { %v1014_v43 = vpop.f32.mrf.mxu3 }
 0x1e6   :  { %v913_v48 = vpop.f32.mrf.mxu2  ;;  %v1213_v24 = vpop.f32.mrf.mxu3 }
 0x1e7   :  { %v914_v56 = vadd.f32 %v1248_v37, %v913_v48 }
 0x1e9   :  { %v1015_v60 = vadd.f32 %v1014_v43, %v914_v56 }
 0x1eb   :  { %v1069_v3 = vadd.f32 %v1068_v61, %v1015_v60 }
 0x1ed   :  { %v1108_v7 = vadd.f32 %v1107_v6, %v1069_v3 }
 0x1ee   :  { %v1176_v9 = vpop.f32.mrf.mxu2 }
 0x1ef   :  { %v1177_v13 = vadd.f32 %v1176_v9, %v1108_v7 }
 0x1f1   :  { %v1214_v31 = vadd.f32 %v1213_v24, %v1177_v13 }
 0x1f3   :  { %1216 = vst [vmem:[#allocation13] sm:$0xff] %v1214_v31 }
 0x1f4   :  { %1227 = dma.vmem_to_hbm [thread:$0]  %s1223_s19, 128, %s1225_s1, [#allocation4]  }
 0x1f5   :  { %1425 = dma.done.wait [#allocation4], 128  }
 0x1f6   :  { %1426 = vsyncadd [#allocation4], 4294967168 }
 0x1f7   :  { %1232 = vsyncpa [#allocation3], 1 }
 0x1f8   :  { %1233 = vsyncpa [#allocation6], 1 }
 0x1f9   :  { %1234 = vsyncpa [#allocation9], 1 }
 0x1fa   :  { %1235 = vsyncpa [#allocation12], 1 }
 0x1fb   :  { %1236 = vsyncpa [#allocation4], 1 }

</bundles_post_ra>
